<compile_context>
chip_gen: v5e
topology: v5e:2x2
jax: 0.10.0
libtpu: 0.0.40
codegen_flags: <defaults>
</compile_context>

<pallas_src>
import functools

import jax
import jax.numpy as jnp
from jax.experimental import pallas as pl
from jax.experimental.pallas import tpu as pltpu


def _round_up(x, m):
    return (x + m - 1) // m * m


def _mtl_heads_kernel(x_ref, w_ref, b_ref, o_ref):
    """Fused multi-task linear heads: o = x @ W_all + b_all.

    x_ref: (TN, D)  bag-instance row tile, streamed in its stored dtype (pipelined)
    w_ref: (D, C)   concatenated head weights, resident in VMEM (bf16 by default)
    b_ref: (1, C)   concatenated head biases, f32, resident in VMEM
    o_ref: (TN, C)  f32 logits tile (unpadded C; each tile is a contiguous HBM chunk)
    """
    x = x_ref[...].astype(w_ref.dtype)            # in-kernel cast (free: VPU slack)
    acc = jnp.dot(x, w_ref[...], preferred_element_type=jnp.float32)
    o_ref[...] = (acc + b_ref[...]).astype(o_ref.dtype)


@functools.partial(jax.jit, static_argnames=("tile_n", "compute_dtype", "out_dtype"))
def mil_mtl_forward(x, w_all, b_all, tile_n=2048, compute_dtype=jnp.bfloat16,
                    out_dtype=jnp.float32):
    """MIL_MTL.forward(x, task_id) for mil='linear'.

    The reference forward ignores task_id (every head is evaluated and concatenated),
    so it is not an argument here.

    x:      (N, input_dim)              bag of instance features
    w_all:  (input_dim, C_total)        concat of per-task Linear weights (pre-transposed)
    b_all:  (C_total,) / (1, C_total)   concat of per-task Linear biases
    compute_dtype: MXU operand dtype.  Defaults to bfloat16 with f32 accumulation (a
        documented deviation from the f32 PyTorch reference; pass jnp.float32 for
        bit-faithful math).
    returns (N, C_total) logits in out_dtype (float32 by default, like the reference).
    """
    n, d = x.shape
    c = w_all.shape[1]
    cdt = jnp.dtype(compute_dtype)
    odt = jnp.dtype(out_dtype)

    b_all = b_all.reshape(1, c).astype(jnp.float32)
    w = w_all.astype(cdt)

    # VMEM-layout-padded sizes (lane dim pads to 128, sublane to 8/16) -- used only for
    # the VMEM budget estimate; no HBM-side padding is performed anywhere.
    d_lane = _round_up(d, 128)
    c_lane = _round_up(c, 128)

    def _vmem_use(t):
        return (2 * t * d_lane * jnp.dtype(x.dtype).itemsize   # double-buffered x tiles
                + 2 * t * c_lane * odt.itemsize                # double-buffered out tiles
                + _round_up(d, 16) * c_lane * cdt.itemsize     # resident weight slab
                + 8 * c_lane * 4)                              # resident bias row

    # Generation-aware VMEM budget: never ask for the full physical VMEM (64 MiB/TC on v7x).
    try:
        vmem_cap = int(pltpu.get_tpu_info().vmem_capacity_bytes)
    except Exception:  # pragma: no cover - fall back to the smallest generation (v7x)
        vmem_cap = 64 * 1024 * 1024
    vmem_budget = min(40 * 1024 * 1024, (vmem_cap * 3) // 5)

    # Row tile: large enough to amortize the ~0.35us/step grid overhead, shrunk for small
    # bags / the VMEM budget, then re-balanced so >=2 grid steps exist (v7x megacore).
    tn = max(16, min(int(tile_n), _round_up(n, 16)))
    tn = _round_up(tn, 16)
    while _vmem_use(tn) > vmem_budget and tn > 16:
        tn = max(16, tn // 2)
    if n > tn:  # >= 2 steps; balance them (helps v7x's 2 TCs, harmless on v5e/v6e)
        tn = min(tn, _round_up((n + 1) // 2, 16))

    grid = (pl.cdiv(n, tn),)
    vmem_limit = int(min(min(56 * 1024 * 1024, vmem_cap - 8 * 1024 * 1024),
                         max(32 * 1024 * 1024, 2 * _vmem_use(tn))))

    # TODO(synk): if input_dim * C_total ever outgrows the resident-weight VMEM budget
    # (many tasks x many classes), add a K-reduction grid axis ("arbitrary", last) with an
    # f32 accumulator scratch instead of shrinking tn; realistic MIL head slabs fit easily.
    out = pl.pallas_call(
        _mtl_heads_kernel,
        out_shape=jax.ShapeDtypeStruct((n, c), odt),
        grid_spec=pltpu.PrefetchScalarGridSpec(
            num_scalar_prefetch=0,
            grid=grid,
            in_specs=[
                # Streamed row tile of bag instances; full-extent (unpadded) feature dim,
                # partial last row block is masked by Pallas.
                pl.BlockSpec((tn, d), lambda i: (i, 0)),
                # Constant weight slab / bias: whole array resident in VMEM once
                # (not double-buffered -- the data never changes across grid steps).
                pl.BlockSpec(memory_space=pltpu.MemorySpace.VMEM),
                pl.BlockSpec(memory_space=pltpu.MemorySpace.VMEM),
            ],
            out_specs=pl.BlockSpec((tn, c), lambda i: (i, 0)),
        ),
        compiler_params=pltpu.CompilerParams(
            # Independent row tiles: lets megacore (v7x: 2 TCs) shard the N axis.
            dimension_semantics=("parallel",),
            vmem_limit_bytes=vmem_limit,
        ),
    )(x, w, b_all)
    return out


def init_head_params(key, input_dim, num_classes):
    """Deterministic per-task nn.Linear params (PyTorch-style uniform init)."""
    ws, bs = [], []
    bound = 1.0 / jnp.sqrt(jnp.float32(input_dim))
    for nc in num_classes:
        kw, kb, key = jax.random.split(key, 3)
        # PyTorch Linear stores weight as (out, in); we keep (in, out) for x @ W.
        w = jax.random.uniform(kw, (input_dim, nc), jnp.float32, -bound, bound)
        b = jax.random.uniform(kb, (nc,), jnp.float32, -bound, bound)
        ws.append(w)
        bs.append(b)
    w_all = jnp.concatenate(ws, axis=-1)           # (input_dim, C_total)
    b_all = jnp.concatenate(bs, axis=-1)[None, :]  # (1, C_total)
    return w_all, b_all


if __name__ == "__main__":
    key = jax.random.PRNGKey(0)
    kx, kp, kx2 = jax.random.split(key, 3)

    # Small, module-consistent shapes: a bag of N=16 patch features of dim 32,
    # num_task=2 heads with num_classes=[3, 5] -> output (16, 8).
    N, INPUT_DIM = 16, 32
    NUM_CLASSES = [3, 5]
    TASK_ID = 0   # unused by the reference forward (all heads are evaluated & concatenated)

    x = jax.random.normal(kx, (N, INPUT_DIM), jnp.float32)
    w_all, b_all = init_head_params(kp, INPUT_DIM, NUM_CLASSES)

    out = jax.block_until_ready(mil_mtl_forward(x, w_all, b_all))

    # Pure-JAX reference with matching compute precision (bf16 operands, f32 accumulate).
    ref = jnp.dot(x.astype(jnp.bfloat16), w_all.astype(jnp.bfloat16),
                  preferred_element_type=jnp.float32) + b_all
    assert out.shape == (N, sum(NUM_CLASSES)), out.shape
    assert out.dtype == jnp.float32, out.dtype
    assert jnp.allclose(out, ref, atol=1e-3, rtol=1e-3), "mismatch vs reference"

    # Ragged bag size (not a multiple of the row tile) exercises the masked-last-block path.
    x2 = jax.random.normal(kx2, (37, INPUT_DIM), jnp.float32)
    out2 = jax.block_until_ready(mil_mtl_forward(x2, w_all, b_all))
    ref2 = jnp.dot(x2.astype(jnp.bfloat16), w_all.astype(jnp.bfloat16),
                   preferred_element_type=jnp.float32) + b_all
    assert out2.shape == (37, sum(NUM_CLASSES)), out2.shape
    assert jnp.allclose(out2, ref2, atol=1e-3, rtol=1e-3), "mismatch (ragged N)"

    print("KERNEL_OK")
</pallas_src>

<mosaic_0001>
module attributes {stable_mosaic.version = 11 : i64} {
  func.func @_mtl_heads_kernel(%arg0: i32, %arg1: memref<16x32xf32, #tpu.memory_space<vmem>>, %arg2: memref<32x8xbf16, #tpu.memory_space<vmem>>, %arg3: memref<1x8xf32, #tpu.memory_space<vmem>>, %arg4: memref<16x8xf32, #tpu.memory_space<vmem>>) attributes {dimension_semantics = [#tpu.dimension_semantics<parallel>], iteration_bounds = array<i64: 1>, scalar_prefetch = 0 : i64, scratch_operands = 0 : i64, tpu.core_type = #tpu.core_type<tc>, window_params = [{transform_indices = @transform_0, window_bounds = array<i64: 16, 32>}, {pipeline_mode = #tpu.pipeline_mode<synchronous>, transform_indices = @transform_1, window_bounds = array<i64: 32, 8>}, {pipeline_mode = #tpu.pipeline_mode<synchronous>, transform_indices = @transform_2, window_bounds = array<i64: 1, 8>}, {transform_indices = @transform_3, window_bounds = array<i64: 16, 8>}]} {
    %c0 = arith.constant 0 : index
    %c0_0 = arith.constant 0 : index
    %0 = vector.load %arg1[%c0, %c0_0] : memref<16x32xf32, #tpu.memory_space<vmem>>, vector<16x32xf32>
    %1 = arith.truncf %0 : vector<16x32xf32> to vector<16x32xbf16>
    %c0_1 = arith.constant 0 : index
    %c0_2 = arith.constant 0 : index
    %2 = vector.load %arg2[%c0_1, %c0_2] : memref<32x8xbf16, #tpu.memory_space<vmem>>, vector<32x8xbf16>
    %cst = arith.constant dense<0.000000e+00> : vector<16x8xf32>
    %3 = tpu.matmul %1, %2, %cst {dimension_numbers = #tpu.dot_dimension_numbers<[1], [0], [0], [1], [0, 0, 1, 1], [], []>} : vector<16x32xbf16>, vector<32x8xbf16>, vector<16x8xf32> -> vector<16x8xf32>
    %c0_3 = arith.constant 0 : index
    %c0_4 = arith.constant 0 : index
    %4 = vector.load %arg3[%c0_3, %c0_4] : memref<1x8xf32, #tpu.memory_space<vmem>>, vector<1x8xf32>
    %5 = vector.broadcast %4 : vector<1x8xf32> to vector<16x8xf32>
    %6 = arith.addf %3, %5 : vector<16x8xf32>
    %c0_5 = arith.constant 0 : index
    %c0_6 = arith.constant 0 : index
    %7 = vector.load %arg4[%c0_5, %c0_6] : memref<16x8xf32, #tpu.memory_space<vmem>>, vector<16x8xf32>
    tpu.vector_store %arg4[%c0_5, %c0_6], %6 {strides = array<i32>} : memref<16x8xf32, #tpu.memory_space<vmem>>, vector<16x8xf32>,
    return
  }
  func.func @transform_0(%arg0: i32) -> (i32, i32) {
    %c0_i32 = arith.constant 0 : i32
    %c0_i32_0 = arith.constant 0 : i32
    return %arg0, %c0_i32 : i32, i32
  }
  func.func @transform_1(%arg0: i32) -> (i32, i32) {
    %c0_i32 = arith.constant 0 : i32
    %c0_i32_0 = arith.constant 0 : i32
    %c0_i32_1 = arith.constant 0 : i32
    return %c0_i32, %c0_i32_0 : i32, i32
  }
  func.func @transform_2(%arg0: i32) -> (i32, i32) {
    %c0_i32 = arith.constant 0 : i32
    %c0_i32_0 = arith.constant 0 : i32
    %c0_i32_1 = arith.constant 0 : i32
    return %c0_i32, %c0_i32_0 : i32, i32
  }
  func.func @transform_3(%arg0: i32) -> (i32, i32) {
    %c0_i32 = arith.constant 0 : i32
    %c0_i32_0 = arith.constant 0 : i32
    return %arg0, %c0_i32 : i32, i32
  }
}

</mosaic_0001>

<bundles_post_ra>
// kernel: mil_mtl_forward.1
= control target key start
LH: loop header
LB: loop body
LE: loop exit
PB: predicated region body
PF: predicated region fallthrough
CT: control target
= control target key end

     0   :  { %vm38_vm0 = vcmask 261120   ;;  %vm56_vm1 = vcmask 64512   ;;  %s116_s1 = inlined_call_operand.vmem [shape: bf16[32,8], index: 1, kind: input, shape index: {}]   ;;  %s117_s0 = inlined_call_operand.vmem [shape: f32[16,32], index: 0, kind: input, shape index: {}]   ;;  %s118_s2 = inlined_call_operand.vmem [shape: f32[1,8], index: 2, kind: input, shape index: {}]   ;;  %s119_s3 = inlined_call_operand.vmem [shape: f32[16,8], index: 3, kind: output, shape index: {}]  }
   0x1   :  { %v73_v0 = vld [vmem:[%s116_s1 + $0x8] sm:$0xff]  ;;  %v72_v1 = vld [vmem:[%s116_s1] sm:$0xff] }
   0x2   :  { %48 = vmatpush.bf16.msra.mxu0 %v73_v0  ;;  %v15_v2 = vld [vmem:[%s117_s0] sm:$0xff]  ;;  %v16_v3 = vld [vmem:[%s117_s0 + $0x8] sm:$0xff] }
   0x3   :  { %v17_v4 = vpack.c.bf16 %v16_v3, %v15_v2  ;;  %v74_v5 = vld [vmem:[%s118_s2] ss:$0 sm:$0xff] }
   0x6   :  { %49 = vmatpush.bf16.msra.mxu0 %v72_v1 }
   0x9   :  { %71 = vmatmul.msk.bf16.vlgmr.msra.gmra.mxu0 %vm38_vm0, %v17_v4 }
  0x86   :  { %v51_v6 = vpop.f32.mrf.mxu0 }
  0x87   :  { %v52_v7 = vadd.f32 %v74_v5, %v51_v6 }
  0x89   :  { %57 = vst.msk [vmem:[%s119_s3] sm:$0xff] %vm56_vm1, %v52_v7 }
  0x8e   :  { %v53_v8 = vpop.f32.mrf.mxu0 }
  0x8f   :  { %v54_v9 = vadd.f32 %v74_v5, %v53_v8 }
  0x91   :  { %58 = vst.msk [vmem:[%s119_s3 + $0x8] sm:$0xff] %vm56_vm1, %v54_v9 }

</bundles_post_ra>
